<compile_context>
chip_gen: v7x
topology: tpu7x:2x2x1
jax: 0.10.0
libtpu: 0.0.40
codegen_flags: <defaults>
</compile_context>

<pallas_src>
import jax
import jax.numpy as jnp
from jax.experimental import pallas as pl
from jax.experimental.pallas import tpu as pltpu


# Total VMEM footprint allowed for the pipeline buffers (2x in + 2x out tiles).
# 24 MiB is comfortably under v7x's 64 MiB physical / 32 MiB default scoped
# VMEM while still giving >= 6 MiB tiles (near the measured ~85% HBM-roofline
# point on all generations).
_DEFAULT_PIPELINE_VMEM_BYTES = 24 << 20
# Explicit scoped-VMEM limit: covers v5e's 16 MiB default, stays within the
# ~48-56 MiB recommendation for v7x (128 MiB physical on v5e/v6e).
_VMEM_LIMIT_BYTES = 48 << 20


def _drop_row_kernel(i_ref, x_ref, o_ref):
    """Copy this (row, col) tile of x; if the dropped row is in this row-block,
    zero that row (full width of this F-block)."""
    # Plain tile copy (this *is* the `x + 0` fresh-tensor path).
    o_ref[...] = x_ref[...]

    tile_r = o_ref.shape[0]
    start = pl.program_id(0) * tile_r          # global row of this block's first row
    i = i_ref[0]                               # dropped row index (SMEM, prefetched)
    i_local = i - start
    in_block = jnp.logical_and(i >= start, i < start + tile_r)

    @pl.when(in_block)
    def _():
        # Targeted single-row store; i_local is guaranteed in [0, tile_r) here,
        # so the dynamic-slice store can never go out of bounds.
        o_ref[pl.ds(i_local, 1), :] = jnp.zeros((1, o_ref.shape[1]), o_ref.dtype)


def _sublane_multiple(dtype):
    # Sub-32-bit dtypes pack rows along sublanes: f32 -> 8, bf16 -> 16, int8 -> 32.
    itemsize = jnp.dtype(dtype).itemsize
    return max(8, 32 // max(1, itemsize))


def _pick_col_tile(F, per_tile_budget, sub, itemsize):
    if F % 128 != 0:
        return F                                   # lane rule: must use the full last dim
    if sub * F * itemsize <= per_tile_budget:
        return F                                   # full-width row tiles fit the budget
    max_f = per_tile_budget // (sub * itemsize)
    tf = max(128, (max_f // 128) * 128)
    # Prefer a width that divides F (keeps every block's store unmasked).
    for cand in range(tf, 127, -128):
        if F % cand == 0:
            return cand
    return tf


def _pick_row_tile(R, per_tile_budget, tile_f, sub, itemsize):
    max_rows = per_tile_budget // max(1, tile_f * itemsize)
    if max_rows >= R:
        return R
    t = max(sub, (max_rows // sub) * sub)
    if t >= R:
        return R
    # Prefer a row tile that divides R (avoids a ragged, masked tail block).
    for cand in range(t, sub - 1, -sub):
        if R % cand == 0:
            return cand
    return t


def drop_attr4(x, adj, row_idx, *, pipeline_vmem_bytes=_DEFAULT_PIPELINE_VMEM_BYTES):
    """x: (R, F) float array, adj: any array (returned unchanged),
    row_idx: int32 scalar with the row to zero (deterministic stand-in for
    Python's random.randint(0, R - 1))."""
    R, F = x.shape
    itemsize = jnp.dtype(x.dtype).itemsize
    sub = _sublane_multiple(x.dtype)

    # Byte-based tile selection: 4x a tile (double-buffered in + out) must fit
    # the pipeline budget.
    per_tile_budget = max(1, pipeline_vmem_bytes // 4)
    tile_f = _pick_col_tile(F, per_tile_budget, sub, itemsize)
    tile_r = _pick_row_tile(R, per_tile_budget, tile_f, sub, itemsize)

    grid = (pl.cdiv(R, tile_r), pl.cdiv(F, tile_f))

    idx = jnp.asarray(row_idx, dtype=jnp.int32).reshape((1,))

    y = pl.pallas_call(
        _drop_row_kernel,
        out_shape=jax.ShapeDtypeStruct((R, F), x.dtype),
        grid_spec=pltpu.PrefetchScalarGridSpec(
            num_scalar_prefetch=1,
            grid=grid,
            in_specs=[pl.BlockSpec((tile_r, tile_f), lambda r, f, i_ref: (r, f))],
            out_specs=pl.BlockSpec((tile_r, tile_f), lambda r, f, i_ref: (r, f)),
        ),
        compiler_params=pltpu.CompilerParams(
            dimension_semantics=("parallel", "parallel"),
            vmem_limit_bytes=_VMEM_LIMIT_BYTES,
        ),
        cost_estimate=pl.CostEstimate(
            flops=0, transcendentals=0, bytes_accessed=2 * R * F * itemsize),
    )(idx, x)

    # adj is returned unmodified, exactly as in the PyTorch module.
    return y, adj


if __name__ == "__main__":
    key = jax.random.PRNGKey(0)
    kx, kadj, ki, kx2 = jax.random.split(key, 4)

    R, F = 64, 128                     # small, TPU-friendly shapes
    x = jax.random.normal(kx, (R, F), dtype=jnp.float32)
    adj = jax.random.normal(kadj, (R, R), dtype=jnp.float32)

    # Deterministic stand-in for python `random.randint(0, row - 1)`.
    row_idx = jax.random.randint(ki, (), 0, R, dtype=jnp.int32)

    # 1) Default (large) budget: whole array is a single block.
    y, adj_out = drop_attr4(x, adj, row_idx)
    jax.block_until_ready((y, adj_out))
    ref = x.at[row_idx].set(0.0)
    assert jnp.allclose(y, ref), "mismatch vs reference (single block)"
    assert jnp.allclose(adj_out, adj), "adj must pass through unchanged"

    # 2) Tiny budget forces 16-row tiles (grid=(4,1)): exercises the per-block
    #    row-offset logic, including a row in the last tile.
    y2, _ = drop_attr4(x, adj, row_idx, pipeline_vmem_bytes=32 * 1024)
    jax.block_until_ready(y2)
    assert jnp.allclose(y2, ref), "mismatch vs reference (row-tiled)"
    y3, _ = drop_attr4(x, adj, jnp.int32(R - 1), pipeline_vmem_bytes=32 * 1024)
    jax.block_until_ready(y3)
    assert jnp.allclose(y3, x.at[R - 1].set(0.0)), "last-tile row drop mismatch"

    # 3) Wider input + even smaller budget forces F-tiling too (grid=(8,2)).
    F2 = 256
    xw = jax.random.normal(kx2, (R, F2), dtype=jnp.float32)
    y4, _ = drop_attr4(xw, adj, row_idx, pipeline_vmem_bytes=16 * 1024)
    jax.block_until_ready(y4)
    assert jnp.allclose(y4, xw.at[row_idx].set(0.0)), "F-tiled row drop mismatch"

    print("KERNEL_OK")
</pallas_src>

<mosaic_0001>
module attributes {stable_mosaic.version = 11 : i64} {
  func.func @_drop_row_kernel(%arg0: i32, %arg1: i32, %arg2: memref<1xi32, #tpu.memory_space<smem>>, %arg3: memref<64x128xf32, #tpu.memory_space<vmem>>, %arg4: memref<64x128xf32, #tpu.memory_space<vmem>>) attributes {dimension_semantics = [#tpu.dimension_semantics<parallel>, #tpu.dimension_semantics<parallel>], iteration_bounds = array<i64: 1, 1>, scalar_prefetch = 1 : i64, scratch_operands = 0 : i64, tpu.core_type = #tpu.core_type<tc>, window_params = [{transform_indices = @transform_0, window_bounds = array<i64: 64, 128>}, {transform_indices = @transform_1, window_bounds = array<i64: 64, 128>}]} {
    %c0 = arith.constant 0 : index
    %c0_0 = arith.constant 0 : index
    %0 = vector.load %arg3[%c0, %c0_0] : memref<64x128xf32, #tpu.memory_space<vmem>>, vector<64x128xf32>
    %c0_1 = arith.constant 0 : index
    %c0_2 = arith.constant 0 : index
    %1 = vector.load %arg4[%c0_1, %c0_2] : memref<64x128xf32, #tpu.memory_space<vmem>>, vector<64x128xf32>
    tpu.vector_store %arg4[%c0_1, %c0_2], %0 {strides = array<i32>} : memref<64x128xf32, #tpu.memory_space<vmem>>, vector<64x128xf32>,
    %c64_i32 = arith.constant 64 : i32
    %2 = arith.muli %arg0, %c64_i32 : i32
    %c0_3 = arith.constant 0 : index
    %3 = memref.load %arg2[%c0_3] : memref<1xi32, #tpu.memory_space<smem>>
    %4 = arith.subi %3, %2 : i32
    %5 = arith.cmpi sge, %3, %2 : i32
    %c64_i32_4 = arith.constant 64 : i32
    %6 = arith.addi %2, %c64_i32_4 : i32
    %7 = arith.cmpi slt, %3, %6 : i32
    %8 = arith.andi %5, %7 : i1
    %9 = arith.extui %8 : i1 to i32
    %c0_i32 = arith.constant 0 : i32
    %10 = arith.cmpi ne, %9, %c0_i32 : i32
    scf.if %10 {
      %cst = arith.constant 0.000000e+00 : f32
      %11 = vector.broadcast %cst : f32 to vector<1x128xf32>
      %12 = arith.index_cast %4 : i32 to index
      %c0_5 = arith.constant 0 : index
      %13 = vector.load %arg4[%12, %c0_5] : memref<64x128xf32, #tpu.memory_space<vmem>>, vector<1x128xf32>
      tpu.vector_store %arg4[%12, %c0_5], %11 {strides = array<i32>} : memref<64x128xf32, #tpu.memory_space<vmem>>, vector<1x128xf32>,
    } else {
    }
    return
  }
  func.func @transform_0(%arg0: i32, %arg1: i32, %arg2: memref<1xi32, #tpu.memory_space<smem>>) -> (i32, i32) {
    %c0_i32 = arith.constant 0 : i32
    return %arg0, %arg1 : i32, i32
  }
  func.func @transform_1(%arg0: i32, %arg1: i32, %arg2: memref<1xi32, #tpu.memory_space<smem>>) -> (i32, i32) {
    %c0_i32 = arith.constant 0 : i32
    return %arg0, %arg1 : i32, i32
  }
}

</mosaic_0001>

<bundles_post_ra>
// kernel: tpu_custom_call.1
= control target key start
LH: loop header
LB: loop body
LE: loop exit
PB: predicated region body
PF: predicated region fallthrough
CT: control target
= control target key end

     0   :  { %8 = vsyncpa [#allocation5], 0  ;;  %s189_s0 = inlined_call_operand.<no memory space> [shape: s32[1], index: 0, kind: input, shape index: {}]   ;;  %s190_s1 = inlined_call_operand.hbm [shape: f32[64,128], index: 1, kind: input, shape index: {}]   ;;  %s191_s2 = inlined_call_operand.hbm [shape: f32[64,128], index: 2, kind: output, shape index: {}]  }
   0x1   :  { %9 = vsyncpa [#allocation6], 0  ;;  %s124_s9 = smov [#allocation4]   ;;  %s76_s13 = scalar_lea.hbm %s190_s1, 1024 }
   0x2   :  { %s15_s10 = sshll.u32 %s124_s9, 4  ;;  %p77_p0 = scmp.ne.s32.totalorder %s190_s1, %s76_s13  ;;  %s16_s10 = int_to_ptr.vmem [resolvable:$true] %s15_s10 }
   0x3   :  { %p80_p1 = scmp.lt.u32.totalorder %s76_s13, %s190_s1 }
   0x5   :  { %p82_p2 = pnand %p80_p1, %p77_p0 }
   0x7   :  { %85 = shalt.err (!%p82_p2)
}
   0x8   :  { %s86_s18 = scalar_lea.vmem %s16_s10, 1024  ;;  %p91_p4 = scmp.lt.s32.totalorder %s16_s10, %s16_s10 }
   0x9   :  { %p87_p3 = scmp.ne.s32.totalorder %s16_s10, %s86_s18  ;;  %p92_p5 = scmp.lt.s32.totalorder %s86_s18, %s86_s18 }
   0xb   :  { %p93_p6 = por %p92_p5, %p91_p4 }
   0xd   :  { %p94_p7 = pnand %p93_p6, %p87_p3 }
   0xf   :  { %97 = shalt.err (!%p94_p7)
}
  0x10   :  { %s125_s19 = smov 128   ;;  %s126_s20 = smov 8  }
  0x11   :  { %21 = dma.hbm_to_vmem [thread:$0]  %s190_s1, 1024, %s16_s10, [#allocation5], %s125_s19, %s125_s19, %s126_s20  }
  0x12   :  { %120 = dma.done.wait [#allocation5], 1024  }
  0x13   :  { %121 = vsyncadd [#allocation5], 4294966272  ;;  %p44_p8 = scmp.ge.s32.totalorder %s189_s0, 0  ;;  %p46_p9 = scmp.lt.s32.totalorder %s189_s0, 64  ;;  %v25_v0 = vld [vmem:[#allocation4] sm:$0xff]  ;;  %v26_v1 = vld [vmem:[#allocation4 + $0x8] sm:$0xff] }
  0x14   :  { %v27_v2 = vld [vmem:[#allocation4 + $0x10] sm:$0xff]  ;;  %33 = vst [vmem:[#allocation7] sm:$0xff] %v25_v0  ;;  %34 = vst [vmem:[#allocation7 + $0x8] sm:$0xff] %v26_v1  ;;  %v28_v3 = vld [vmem:[#allocation4 + $0x18] sm:$0xff] }
  0x15   :  { %p165_p10 = pnand %p46_p9, %p44_p8  ;;  %35 = vst [vmem:[#allocation7 + $0x10] sm:$0xff] %v27_v2  ;;  %v29_v4 = vld [vmem:[#allocation4 + $0x20] sm:$0xff]  ;;  %v30_v5 = vld [vmem:[#allocation4 + $0x28] sm:$0xff]  ;;  %36 = vst [vmem:[#allocation7 + $0x18] sm:$0xff] %v28_v3 }
  0x16   :  { %37 = vst [vmem:[#allocation7 + $0x20] sm:$0xff] %v29_v4  ;;  %38 = vst [vmem:[#allocation7 + $0x28] sm:$0xff] %v30_v5  ;;  %v31_v6 = vld [vmem:[#allocation4 + $0x30] sm:$0xff]  ;;  %v32_v7 = vld [vmem:[#allocation4 + $0x38] sm:$0xff]  ;;  %s51_s29 = scalar_lea.vmem (!%p165_p10), [#allocation7], %s189_s0  ;;  %v127_v8 = vmov (!%p165_p10), 0.0  }
  0x17   :  { %39 = vst [vmem:[#allocation7 + $0x30] sm:$0xff] %v31_v6  ;;  %40 = vst [vmem:[#allocation7 + $0x38] sm:$0xff] %v32_v7  ;;  %50 = sbr.rel (%p165_p10) target bundleno = 30 (0x1e), region = 13 }
  0x18   :  { %52 = vst [vmem:[%s51_s29] sm:$0x1] (!%p165_p10), %v127_v8 }
  0x1e PF:  { %s128_s30 = smov [#allocation7]  }
  0x1f   :  { %s58_s3 = sshll.u32 %s128_s30, 4  ;;  %s59_s3 = int_to_ptr.vmem [resolvable:$true] %s58_s3 }
  0x20   :  { %s98_s4 = scalar_lea.vmem %s59_s3, 1024  ;;  %p103_p12 = scmp.lt.s32.totalorder %s59_s3, %s59_s3 }
  0x21   :  { %p99_p11 = scmp.ne.s32.totalorder %s59_s3, %s98_s4  ;;  %p104_p13 = scmp.lt.s32.totalorder %s98_s4, %s98_s4 }
  0x23   :  { %p105_p0 = por %p104_p13, %p103_p12 }
  0x25   :  { %p106_p1 = pnand %p105_p0, %p99_p11 }
  0x27   :  { %109 = shalt.err (!%p106_p1)
}
  0x28   :  { %s110_s7 = scalar_lea.hbm %s191_s2, 1024 }
  0x29   :  { %p111_p2 = scmp.ne.s32.totalorder %s191_s2, %s110_s7  ;;  %p114_p3 = scmp.lt.u32.totalorder %s110_s7, %s191_s2 }
  0x2b   :  { %p116_p4 = pnand %p114_p3, %p111_p2 }
  0x2d   :  { %119 = shalt.err (!%p116_p4)
}
  0x2e   :  { %64 = dma.vmem_to_hbm [thread:$0]  %s59_s3, 1024, %s191_s2, [#allocation6], %s125_s19, %s125_s19, %s126_s20  }
  0x2f   :  { %122 = dma.done.wait [#allocation6], 1024  }
  0x30   :  { %123 = vsyncadd [#allocation6], 4294966272 }
  0x31   :  { %68 = vsyncpa [#allocation5], 1 }
  0x32   :  { %69 = vsyncpa [#allocation6], 1 }

</bundles_post_ra>
